<compile_context>
chip_gen: v5e
topology: v5e:2x2
jax: 0.10.0
libtpu: 0.0.40
codegen_flags: <defaults>
</compile_context>

<pallas_src>
import jax
import jax.numpy as jnp
from jax import lax
from jax.experimental import pallas as pl
from jax.experimental.pallas import tpu as pltpu


def _round_up(x: int, m: int) -> int:
    return ((x + m - 1) // m) * m


def _predictor_kernel(x_ref, w1t_ref, b1_ref, w2_ref, b2_ref, o_ref):
    # x_ref:   (TB, E)  VMEM bf16   (tiled over batch)
    # w1t_ref: (E, H)   VMEM bf16   (resident across grid steps, (K, N) layout)
    # b1_ref:  (1, H)   VMEM f32    (resident)
    # w2_ref:  (1, H)   VMEM f32    (resident)
    # b2_ref:  (1, 1)   SMEM scalar
    # o_ref:   (1, TB)  VMEM f32    (lane-dense output row)
    x = x_ref[...]

    # Layer 1: (TB, E) @ (E, H) -> (TB, H), f32 accumulation on the MXU.
    h = lax.dot_general(
        x, w1t_ref[...],
        dimension_numbers=(((1,), (0,)), ((), ())),
        preferred_element_type=jnp.float32,
    ) + b1_ref[...]
    h = jnp.maximum(h, 0.0)  # ReLU on the VPU

    # Layer 2: contract H of w2 (1, H) with H of h (TB, H) -> (1, TB).
    # Result is lane-dense (batch along lanes), so the store is unmasked.
    out = lax.dot_general(
        w2_ref[...], h,
        dimension_numbers=(((1,), (1,)), ((), ())),
        preferred_element_type=jnp.float32,
    )
    o_ref[...] = out + b2_ref[0, 0]


def predictor_forward(x, w1, b1, w2, b2, *, block_b: int = 4096):
    """x: (B, E) f32; w1: (H, E); b1: (H,); w2: (1, H); b2: (1,). Returns (B, 1)."""
    B, E = x.shape
    H = w1.shape[0]

    # Batch tile: multiple of 128 (lane-dense output + bf16 sublane packing).
    TB = min(_round_up(block_b, 128), _round_up(B, 128))
    B_pad = _round_up(B, TB)
    if B_pad != B:
        x = jnp.pad(x, ((0, B_pad - B), (0, 0)))

    # bf16 activations/weights for layer 1 (f32 accumulate inside the kernel).
    x_bf = x.astype(jnp.bfloat16)
    w1t_bf = jnp.transpose(w1).astype(jnp.bfloat16)  # (E, H), MXU-natural (K, N)

    b1_2d = b1.reshape(1, H).astype(jnp.float32)   # (1, H)
    w2_2d = w2.reshape(1, H).astype(jnp.float32)   # (1, H)
    b2_2d = b2.reshape(1, 1).astype(jnp.float32)   # (1, 1) scalar -> SMEM

    grid = (pl.cdiv(B_pad, TB),)

    out_row = pl.pallas_call(
        _predictor_kernel,
        out_shape=jax.ShapeDtypeStruct((1, B_pad), jnp.float32),
        grid=grid,
        in_specs=[
            pl.BlockSpec((TB, E), lambda i: (i, 0)),   # x: tiled over batch
            pl.BlockSpec((E, H), lambda i: (0, 0)),    # w1^T: VMEM-resident
            pl.BlockSpec((1, H), lambda i: (0, 0)),    # b1: VMEM-resident
            pl.BlockSpec((1, H), lambda i: (0, 0)),    # w2: VMEM-resident
            pl.BlockSpec(memory_space=pltpu.MemorySpace.SMEM),  # b2 scalar
        ],
        out_specs=pl.BlockSpec((1, TB), lambda i: (0, i)),  # lane-dense row
        compiler_params=pltpu.CompilerParams(
            dimension_semantics=("parallel",),
        ),
    )(x_bf, w1t_bf, b1_2d, w2_2d, b2_2d)

    # (1, B_pad) -> slice off padded rows -> module's (B, 1).
    return out_row[0, :B].reshape(B, 1)


def _reference(x, w1, b1, w2, b2):
    # Reference with the same bf16 rounding of x/w1 the kernel uses
    # (f32 math thereafter), so the comparison isolates kernel correctness.
    xq = x.astype(jnp.bfloat16).astype(jnp.float32)
    w1q = w1.astype(jnp.bfloat16).astype(jnp.float32)
    h = jnp.maximum(xq @ w1q.T + b1, 0.0)
    return h @ w2.T + b2


if __name__ == "__main__":
    key = jax.random.PRNGKey(0)
    k_x, k_w1, k_b1, k_w2, k_b2 = jax.random.split(key, 5)

    B, E, H = 200, 256, 128  # batch, embedding_length, hidden

    x = jax.random.normal(k_x, (B, E), dtype=jnp.float32)
    # Deterministic synthetic parameters (PyTorch-like uniform init bounds).
    bound1 = 1.0 / (E ** 0.5)
    bound2 = 1.0 / (H ** 0.5)
    w1 = jax.random.uniform(k_w1, (H, E), jnp.float32, -bound1, bound1)
    b1 = jax.random.uniform(k_b1, (H,), jnp.float32, -bound1, bound1)
    w2 = jax.random.uniform(k_w2, (1, H), jnp.float32, -bound2, bound2)
    b2 = jax.random.uniform(k_b2, (1,), jnp.float32, -bound2, bound2)

    # Small tile so the run exercises a multi-step grid (TB=128 -> 2 steps)
    # plus batch padding (200 -> 256) and the pad-slice path.
    out = predictor_forward(x, w1, b1, w2, b2, block_b=128)
    out = jax.block_until_ready(out)

    ref = _reference(x, w1, b1, w2, b2)
    assert out.shape == (B, 1), out.shape
    # Tolerance covers MXU-vs-XLA accumulation-order differences only
    # (both sides see the same bf16-rounded inputs).
    assert jnp.allclose(out, ref, atol=2e-3, rtol=2e-3), "mismatch vs reference"

    print("KERNEL_OK")
</pallas_src>

<mosaic_0001>
module attributes {stable_mosaic.version = 11 : i64} {
  func.func @_predictor_kernel(%arg0: i32, %arg1: memref<128x256xbf16, #tpu.memory_space<vmem>>, %arg2: memref<256x128xbf16, #tpu.memory_space<vmem>>, %arg3: memref<1x128xf32, #tpu.memory_space<vmem>>, %arg4: memref<1x128xf32, #tpu.memory_space<vmem>>, %arg5: memref<1x1xf32, #tpu.memory_space<smem>>, %arg6: memref<1x128xf32, #tpu.memory_space<vmem>>) attributes {dimension_semantics = [#tpu.dimension_semantics<parallel>], iteration_bounds = array<i64: 2>, scalar_prefetch = 0 : i64, scratch_operands = 0 : i64, tpu.core_type = #tpu.core_type<tc>, window_params = [{transform_indices = @transform_0, window_bounds = array<i64: 128, 256>}, {pipeline_mode = #tpu.pipeline_mode<synchronous>, transform_indices = @transform_1, window_bounds = array<i64: 256, 128>}, {pipeline_mode = #tpu.pipeline_mode<synchronous>, transform_indices = @transform_2, window_bounds = array<i64: 1, 128>}, {pipeline_mode = #tpu.pipeline_mode<synchronous>, transform_indices = @transform_3, window_bounds = array<i64: 1, 128>}, {transform_indices = @transform_4, window_bounds = array<i64: 1, 1>}, {transform_indices = @transform_5, window_bounds = array<i64: 1, 128>}]} {
    %c0 = arith.constant 0 : index
    %c0_0 = arith.constant 0 : index
    %0 = vector.load %arg1[%c0, %c0_0] : memref<128x256xbf16, #tpu.memory_space<vmem>>, vector<128x256xbf16>
    %c0_1 = arith.constant 0 : index
    %c0_2 = arith.constant 0 : index
    %1 = vector.load %arg2[%c0_1, %c0_2] : memref<256x128xbf16, #tpu.memory_space<vmem>>, vector<256x128xbf16>
    %cst = arith.constant dense<0.000000e+00> : vector<128x128xf32>
    %2 = tpu.matmul %0, %1, %cst {dimension_numbers = #tpu.dot_dimension_numbers<[1], [0], [0], [1], [0, 0, 1, 1], [], []>} : vector<128x256xbf16>, vector<256x128xbf16>, vector<128x128xf32> -> vector<128x128xf32>
    %c0_3 = arith.constant 0 : index
    %c0_4 = arith.constant 0 : index
    %3 = vector.load %arg3[%c0_3, %c0_4] : memref<1x128xf32, #tpu.memory_space<vmem>>, vector<1x128xf32>
    %4 = vector.broadcast %3 : vector<1x128xf32> to vector<128x128xf32>
    %5 = arith.addf %2, %4 : vector<128x128xf32>
    %cst_5 = arith.constant 0.000000e+00 : f32
    %6 = vector.broadcast %cst_5 : f32 to vector<128x128xf32>
    %7 = arith.maximumf %5, %6 : vector<128x128xf32>
    %c0_6 = arith.constant 0 : index
    %c0_7 = arith.constant 0 : index
    %8 = vector.load %arg4[%c0_6, %c0_7] : memref<1x128xf32, #tpu.memory_space<vmem>>, vector<1x128xf32>
    %cst_8 = arith.constant dense<0.000000e+00> : vector<1x128xf32>
    %9 = tpu.matmul %8, %7, %cst_8 {dimension_numbers = #tpu.dot_dimension_numbers<[1], [1], [0], [0], [0, 0, 1, 0], [], []>} : vector<1x128xf32>, vector<128x128xf32>, vector<1x128xf32> -> vector<1x128xf32>
    %c0_9 = arith.constant 0 : index
    %c0_10 = arith.constant 0 : index
    %10 = memref.load %arg5[%c0_9, %c0_10] : memref<1x1xf32, #tpu.memory_space<smem>>
    %11 = vector.broadcast %10 : f32 to vector<1x128xf32>
    %12 = arith.addf %9, %11 : vector<1x128xf32>
    %c0_11 = arith.constant 0 : index
    %c0_12 = arith.constant 0 : index
    %13 = vector.load %arg6[%c0_11, %c0_12] : memref<1x128xf32, #tpu.memory_space<vmem>>, vector<1x128xf32>
    tpu.vector_store %arg6[%c0_11, %c0_12], %12 {strides = array<i32>} : memref<1x128xf32, #tpu.memory_space<vmem>>, vector<1x128xf32>,
    return
  }
  func.func @transform_0(%arg0: i32) -> (i32, i32) {
    %c0_i32 = arith.constant 0 : i32
    %c0_i32_0 = arith.constant 0 : i32
    return %arg0, %c0_i32 : i32, i32
  }
  func.func @transform_1(%arg0: i32) -> (i32, i32) {
    %c0_i32 = arith.constant 0 : i32
    %c0_i32_0 = arith.constant 0 : i32
    %c0_i32_1 = arith.constant 0 : i32
    return %c0_i32, %c0_i32_0 : i32, i32
  }
  func.func @transform_2(%arg0: i32) -> (i32, i32) {
    %c0_i32 = arith.constant 0 : i32
    %c0_i32_0 = arith.constant 0 : i32
    %c0_i32_1 = arith.constant 0 : i32
    return %c0_i32, %c0_i32_0 : i32, i32
  }
  func.func @transform_3(%arg0: i32) -> (i32, i32) {
    %c0_i32 = arith.constant 0 : i32
    %c0_i32_0 = arith.constant 0 : i32
    %c0_i32_1 = arith.constant 0 : i32
    return %c0_i32, %c0_i32_0 : i32, i32
  }
  func.func @transform_4(%arg0: i32) -> (i32, i32) {
    %c0_i32 = arith.constant 0 : i32
    %c0_i32_0 = arith.constant 0 : i32
    %c0_i32_1 = arith.constant 0 : i32
    return %c0_i32, %c0_i32_0 : i32, i32
  }
  func.func @transform_5(%arg0: i32) -> (i32, i32) {
    %c0_i32 = arith.constant 0 : i32
    %c0_i32_0 = arith.constant 0 : i32
    return %c0_i32, %arg0 : i32, i32
  }
}

</mosaic_0001>

<bundles_post_ra>
// kernel: tpu_custom_call.1
= control target key start
LH: loop header
LB: loop body
LE: loop exit
PB: predicated region body
PF: predicated region fallthrough
CT: control target
= control target key end

     0   :  { %s1356_s0 = inlined_call_operand.hbm [shape: bf16[256,256], index: 0, kind: input, shape index: {}]   ;;  %s1357_s1 = inlined_call_operand.hbm [shape: bf16[256,128], index: 1, kind: input, shape index: {}]   ;;  %s1358_s2 = inlined_call_operand.vmem [shape: f32[1,128], index: 2, kind: input, shape index: {}]   ;;  %s1359_s3 = inlined_call_operand.vmem [shape: f32[1,128], index: 3, kind: input, shape index: {}]   ;;  %s1360_s4 = inlined_call_operand.<no memory space> [shape: f32[1,1], index: 4, kind: input, shape index: {}]   ;;  %s1361_s5 = inlined_call_operand.hbm [shape: f32[1,256], index: 5, kind: output, shape index: {}]  }
   0x1   :  { %10 = sst [smem:[#allocation2]] %s1360_s4 }
   0x2   :  { %11 = vsyncpa [#allocation4], 0 }
   0x3   :  { %13 = vsyncpa [#allocation4 + $0x1], 0 }
   0x4   :  { %14 = vsyncpa [#allocation7], 0 }
   0x5   :  { %15 = vsyncpa [#allocation5], 0 }
   0x6   :  { %17 = vsyncpa [#allocation5 + $0x1], 0  ;;  %s1142_s20 = smov 0   ;;  %s1144_s21 = smov 0  }
   0x7   :  { %s1146_s22 = smov 0   ;;  %s1148_s23 = smov 0  }
   0x8 LB: > { %s1163_s4 = sadd.s32 4294967295, %s1102_s23   ;;  %s719_s24 = sadd.s32 4294967294, %s1102_s23   ;;  %s1102_s23 = sphi %s1148_s23, %s1371_s23   ;;  %s1098_s22 = sphi %s1146_s22, %s1370_s22   ;;  %s1094_s21 = sphi %s1144_s21, %s1369_s21   ;;  %s1090_s20 = sphi %s1142_s20, %s1368_s20  }
   0x9   : > { %p43_p0 = scmp.ne.s32.totalorder %s1094_s21, %s1090_s20  ;;  %p44_p1 = scmp.eq.s32.totalorder %s1163_s4, 0 }
   0xa   : > { %p151_p2 = scmp.eq.s32.totalorder %s1163_s4, 1  ;;  %p157_p3 = scmp.eq.s32.totalorder %s719_s24, 1 }
   0xb   : > { %p1172_p4 = por %p44_p1, %p43_p0  ;;  %p720_p5 = scmp.ge.s32.totalorder %s1102_s23, 1 }
   0xc   : > { %p1177_p6 = por %p157_p3, %p43_p0  ;;  %p164_p7 = scmp.lt.s32.totalorder %s1102_s23, 3 }
   0xd   : > { %s175_s29 = sshll.u32 %s1357_s1, 4  ;;  %s1104_s6 = smov [#allocation6]   ;;  %s176_s29 = int_to_ptr.hbm [resolvable:$true] %s175_s29 }
   0xe   : > { %p1185_p8 = pnand %p720_p5, %p164_p7  ;;  %s177_s7 = sshll.u32 %s1104_s6, 4  ;;  %s178_s7 = int_to_ptr.vmem [resolvable:$true] %s177_s7 }
   0xf   : > { %s1195_s8 = sadd.s32 1, %s1102_s23   ;;  %s1105_s9 = smov 64  }
  0x10   : > { %p918_p9 = pneg %p1185_p8  ;;  %s1106_s10 = smov 4  }
  0x11   : > { %s27_s11 = ssub.s32 %s1102_s23, %s1195_s8  ;;  %s30_s12 = sadd.s32 1, %s1098_s22 }
  0x12   : > { %p919_p10 = pnand %p918_p9, %p44_p1  ;;  %p28_p12 = scmp.eq.s32.totalorder %s27_s11, 0 }
  0x13   : > { %p37_p13 = scmp.ne.s32.totalorder %s1098_s22, %s1094_s21  ;;  %p38_p0 = scmp.eq.s32.totalorder %s1102_s23, 0 }
  0x14   : > { %921 = dma.hbm_to_vmem [thread:$0]  (!%p919_p10), %s176_s29, 2048, %s178_s7, [#allocation7], %s1105_s9, %s1105_s9, %s1106_s10  }
  0x15   : > { %p931_p3 = scmp.lt.s32.totalorder %s1102_s23, 2  ;;  %p39_p5 = por %p38_p0, %p37_p13 }
  0x16   : > { %s1205_s13 = scalar_select %p28_p12, %s1098_s22, %s30_s12  }
  0x17   : > { %p1209_p7 = por %p151_p2, %p37_p13  ;;  %s200_s15 = sand.u32 1, %s1098_s22  }
  0x18   : > { %s861_s16 = sshll.u32 %s1102_s23, 7  ;;  %s723_s17 = sshll.u32 %s200_s15, 7 }
  0x19   : > { %s210_s24 = scalar_lea.hbm %s1356_s0, %s861_s16  ;;  %s204_s28 = scalar_lea.vmem [#allocation3], %s723_s17 }
  0x1a   : > { %s211_s27 = sshll.u32 %s210_s24, 4  ;;  %s213_s29 = sshll.u32 %s204_s28, 4  ;;  %s212_s27 = int_to_ptr.hbm [resolvable:$true] %s211_s27  ;;  %s214_s29 = int_to_ptr.vmem [resolvable:$true] %s213_s29 }
  0x1b   : > { %p1220_p9 = pnand %p931_p3, %p39_p5  ;;  %s201_s7 = scalar_lea.sflag [#allocation4], %s200_s15 }
  0x1c   : > { %s1002_s9 = sshra.s32 %s212_s27, 4  ;;  %s1009_s16 = scalar_lea.hbm %s1356_s0, 256  ;;  %s1003_s9 = int_to_ptr.hbm [resolvable:$true] %s1002_s9 }
  0x1d   : > { %s1004_s10 = scalar_lea.hbm %s1003_s9, 128  ;;  %p1006_p10 = pneg %p1220_p9 }
  0x1e   : > { %p1005_p2 = scmp.ne.s32.totalorder %s1003_s9, %s1004_s10  ;;  %p1010_p0 = scmp.lt.s32.totalorder %s1003_s9, %s1356_s0 }
  0x1f   : > { %p1011_p3 = scmp.lt.s32.totalorder %s1009_s16, %s1004_s10 }
  0x20   : > { %p1007_p12 = pnand %p1006_p10, %p1005_p2 }
  0x21   : > { %p1012_p5 = por %p1011_p3, %p1010_p0 }
  0x22   : > { %p1008_p13 = pneg %p1007_p12 }
  0x24   : > { %p1013_p11 = pnand %p1012_p5, %p1008_p13 }
  0x26   : > { %1016 = shalt.err (!%p1013_p11)
}
  0x27   : > { %s1107_s15 = smov 128   ;;  %s1108_s19 = smov 8  }
  0x28   : > { %925 = dma.hbm_to_vmem [thread:$0]  (!%p1220_p9), %s212_s27, 2048, %s214_s29, %s201_s7, %s1107_s15, %s1107_s15, %s1108_s19  }
  0x29   : > { %225 = sbr.rel (%p1185_p8) target bundleno = 474 (0x1da), region = 40  ;;  %s1237_s24 = sand.u32 (!%p1185_p8), 1, %s1094_s21  }
  0x2a   : > { %s728_s28 = sshll.u32 (!%p1185_p8), %s1237_s24, 7  ;;  %s228_s9 = scalar_lea.sflag (!%p1185_p8), [#allocation4], %s1237_s24 }
  0x2b   : > { %s1241_s10 = scalar_lea.vmem (!%p1185_p8), [#allocation3], %s728_s28 }
  0x2e   : > { %1077 = dma.done.wait (%p1172_p4), %s228_s9, 2048  }
  0x2f   : > { %1079 = vsyncadd (%p1172_p4), %s228_s9, 4294965248 }
  0x30   : > { %1081 = dma.done.wait (%p44_p1), [#allocation7], 2048  }
  0x31   : > { %1083 = vsyncadd (%p44_p1), [#allocation7], 4294965248  ;;  %v885_v0 = vld [vmem:[#allocation6 + $0x38] sm:$0xff]  ;;  %v884_v2 = vld [vmem:[#allocation6 + $0x30] sm:$0xff]  ;;  %s607_s6 = sld [smem:[#allocation2]]  ;;  %s639_s12 = scalar_lea.hbm %s1361_s5, %s1163_s4 }
  0x32   : > { %v893_v1 = vld [vmem:[#allocation6 + $0x78] sm:$0xff]  ;;  %492 = vmatpush.bf16.msra.mxu0 %v885_v0  ;;  %v892_v3 = vld [vmem:[#allocation6 + $0x70] sm:$0xff]  ;;  %894 = vmatpush.bf16.msra.mxu3 %v885_v0  ;;  %v883_v4 = vld [vmem:[#allocation6 + $0x28] sm:$0xff]  ;;  %s262_s16 = scalar_lea.vmem [#allocation8], %s1237_s24  ;;  %s643_s18 = sshll.u32 %s639_s12, 4  ;;  %s644_s18 = int_to_ptr.hbm [resolvable:$true] %s643_s18 }
  0x33   : > { %902 = vmatpush.bf16.msra.mxu2 %v893_v1  ;;  %541 = vmatpush.bf16.msra.mxu1 %v893_v1  ;;  %v891_v5 = vld [vmem:[#allocation6 + $0x68] sm:$0xff]  ;;  %v882_v6 = vld [vmem:[#allocation6 + $0x20] sm:$0xff]  ;;  %v881_v8 = vld [vmem:[#allocation6 + $0x18] sm:$0xff]  ;;  %s641_s17 = sshll.u32 %s262_s16, 4  ;;  %s631_s15 = scalar_lea.sflag [#allocation5], %s1237_s24  ;;  %s642_s17 = int_to_ptr.vmem [resolvable:$true] %s641_s17 }
  0x34   : > { %v890_v7 = vld [vmem:[#allocation6 + $0x60] sm:$0xff]  ;;  %v889_v9 = vld [vmem:[#allocation6 + $0x58] sm:$0xff]  ;;  %v880_v10 = vld [vmem:[#allocation6 + $0x10] sm:$0xff]  ;;  %s1046_s19 = sshra.s32 %s644_s18, 4  ;;  %s1052_s4 = scalar_lea.hbm %s1361_s5, 2  ;;  %s1047_s19 = int_to_ptr.hbm [resolvable:$true] %s1046_s19 }
  0x35   : > { %v888_v11 = vld [vmem:[#allocation6 + $0x50] sm:$0xff]  ;;  %v879_v12 = vld [vmem:[#allocation6 + $0x8] sm:$0xff]  ;;  %v878_v14 = vld [vmem:[#allocation6] sm:$0xff]  ;;  %s1048_s28 = scalar_lea.hbm %s1047_s19, 1  ;;  %p1053_p11 = scmp.lt.s32.totalorder %s1047_s19, %s1361_s5 }
  0x36   : > { %493 = vmatpush.bf16.msra.mxu0 %v884_v2  ;;  %895 = vmatpush.bf16.msra.mxu3 %v884_v2  ;;  %v887_v13 = vld [vmem:[#allocation6 + $0x48] sm:$0xff]  ;;  %v886_v15 = vld [vmem:[#allocation6 + $0x40] sm:$0xff]  ;;  %v772_v20 = vld [vmem:[%s1241_s10 + $0x50] sm:$0xf]  ;;  %p1049_p1 = scmp.ne.s32.totalorder %s1047_s19, %s1048_s28  ;;  %p1054_p9 = scmp.lt.s32.totalorder %s1052_s4, %s1048_s28 }
  0x37   : > { %903 = vmatpush.bf16.msra.mxu2 %v892_v3  ;;  %542 = vmatpush.bf16.msra.mxu1 %v892_v3  ;;  %v732_v16 = vld [vmem:[%s1241_s10] sm:$0xf]  ;;  %v863_v17 = vld [vmem:[%s1241_s10 + $0x4] sm:$0xf0]  ;;  %v870_v18 = vld [vmem:[%s1241_s10 + $0x44] sm:$0xf] }
  0x38   : > { %v766_v19 = vld [vmem:[%s1241_s10 + $0x48] sm:$0xf0]  ;;  %v873_v21 = vld [vmem:[%s1241_s10 + $0x54] sm:$0xf0]  ;;  %v862_v22 = vld [vmem:[%s1241_s10 + $0x4] sm:$0xf]  ;;  %v733_v24 = vor.u32 %v863_v17, %v732_v16  ;;  %p1050_p4 = pnand %p1049_p1, %p1209_p7  ;;  %p1055_p2 = por %p1054_p9, %p1053_p11 }
  0x39   : > { %v734_v23 = vld [vmem:[%s1241_s10 + $0x8] sm:$0xf0]  ;;  %v769_v25 = vor.u32 %v870_v18, %v766_v19  ;;  %v773_v26 = vor.u32 %v873_v21, %v772_v20  ;;  %v740_v28 = vld [vmem:[%s1241_s10 + $0x10] sm:$0xf]  ;;  %v865_v29 = vld [vmem:[%s1241_s10 + $0x14] sm:$0xf0] }
  0x3a   : > { %494 = vmatpush.bf16.msra.mxu0 %v883_v4  ;;  %896 = vmatpush.bf16.msra.mxu3 %v883_v4  ;;  %v737_v27 = vor.u32 %v862_v22, %v734_v23  ;;  %v872_v30 = vld [vmem:[%s1241_s10 + $0x54] sm:$0xf]  ;;  %v774_v31 = vld [vmem:[%s1241_s10 + $0x58] sm:$0xf0]  ;;  %v780_v32 = vld [vmem:[%s1241_s10 + $0x60] sm:$0xf]  ;;  %v741_v36 = vor.u32 %v865_v29, %v740_v28  ;;  %p1051_p8 = pneg %p1050_p4 }
  0x3b   : > { %904 = vmatpush.bf16.msra.mxu2 %v891_v5  ;;  %543 = vmatpush.bf16.msra.mxu1 %v891_v5  ;;  %v875_v33 = vld [vmem:[%s1241_s10 + $0x64] sm:$0xf0]  ;;  %v864_v34 = vld [vmem:[%s1241_s10 + $0x14] sm:$0xf]  ;;  %v742_v35 = vld [vmem:[%s1241_s10 + $0x18] sm:$0xf0]  ;;  %v777_v37 = vor.u32 %v872_v30, %v774_v31 }
  0x3c   : > { %v781_v38 = vor.u32 %v875_v33, %v780_v32  ;;  %v745_v39 = vor.u32 %v864_v34, %v742_v35  ;;  %v748_v40 = vld [vmem:[%s1241_s10 + $0x20] sm:$0xf]  ;;  %v867_v41 = vld [vmem:[%s1241_s10 + $0x24] sm:$0xf0]  ;;  %v874_v42 = vld [vmem:[%s1241_s10 + $0x64] sm:$0xf]  ;;  %p1056_p10 = pnand %p1055_p2, %p1051_p8 }
  0x3d   : > { %v782_v43 = vld [vmem:[%s1241_s10 + $0x68] sm:$0xf0]  ;;  %v788_v44 = vld [vmem:[%s1241_s10 + $0x70] sm:$0xf]  ;;  %v877_v45 = vld [vmem:[%s1241_s10 + $0x74] sm:$0xf0]  ;;  %v749_v48 = vor.u32 %v867_v41, %v748_v40 }
  0x3e   : > { %495 = vmatpush.bf16.msra.mxu0 %v882_v6  ;;  %897 = vmatpush.bf16.msra.mxu3 %v882_v6  ;;  %v866_v46 = vld [vmem:[%s1241_s10 + $0x24] sm:$0xf]  ;;  %v750_v47 = vld [vmem:[%s1241_s10 + $0x28] sm:$0xf0]  ;;  %v785_v49 = vor.u32 %v874_v42, %v782_v43  ;;  %v789_v50 = vor.u32 %v877_v45, %v788_v44  ;;  %v756_v52 = vld [vmem:[%s1241_s10 + $0x30] sm:$0xf] }
  0x3f   : > { %905 = vmatpush.bf16.msra.mxu2 %v890_v7  ;;  %544 = vmatpush.bf16.msra.mxu1 %v890_v7  ;;  %v753_v51 = vor.u32 %v866_v46, %v750_v47  ;;  %v869_v53 = vld [vmem:[%s1241_s10 + $0x34] sm:$0xf0]  ;;  %v876_v54 = vld [vmem:[%s1241_s10 + $0x74] sm:$0xf]  ;;  %v790_v55 = vld [vmem:[%s1241_s10 + $0x78] sm:$0xf0] }
  0x40   : > { %v868_v56 = vld [vmem:[%s1241_s10 + $0x34] sm:$0xf]  ;;  %v758_v57 = vld [vmem:[%s1241_s10 + $0x38] sm:$0xf0]  ;;  %v757_v58 = vor.u32 %v869_v53, %v756_v52  ;;  %v793_v59 = vor.u32 %v876_v54, %v790_v55  ;;  %v764_v61 = vld [vmem:[%s1241_s10 + $0x40] sm:$0xf] }
  0x41   : > { %v761_v60 = vor.u32 %v868_v56, %v758_v57  ;;  %v871_v62 = vld [vmem:[%s1241_s10 + $0x44] sm:$0xf0]  ;;  %v1286_v0 = vld [vmem:[%s1358_s2] ss:$0 sm:$0xff] }
  0x42   : > { %496 = vmatpush.bf16.msra.mxu0 %v881_v8  ;;  %898 = vmatpush.bf16.msra.mxu3 %v881_v8  ;;  %v765_v63 = vor.u32 %v871_v62, %v764_v61 }
  0x43   : > { %906 = vmatpush.bf16.msra.mxu2 %v889_v9  ;;  %545 = vmatpush.bf16.msra.mxu1 %v889_v9 }
  0x46   : > { %497 = vmatpush.bf16.msra.mxu0 %v880_v10  ;;  %899 = vmatpush.bf16.msra.mxu3 %v880_v10 }
  0x47   : > { %907 = vmatpush.bf16.msra.mxu2 %v888_v11  ;;  %546 = vmatpush.bf16.msra.mxu1 %v888_v11 }
  0x4a   : > { %498 = vmatpush.bf16.msra.mxu0 %v879_v12  ;;  %900 = vmatpush.bf16.msra.mxu3 %v879_v12 }
  0x4b   : > { %908 = vmatpush.bf16.msra.mxu2 %v887_v13  ;;  %547 = vmatpush.bf16.msra.mxu1 %v887_v13 }
  0x4e   : > { %499 = vmatpush.bf16.msra.mxu0 %v878_v14  ;;  %901 = vmatpush.bf16.msra.mxu3 %v878_v14 }
  0x4f   : > { %909 = vmatpush.bf16.msra.mxu2 %v886_v15  ;;  %548 = vmatpush.bf16.msra.mxu1 %v886_v15 }
  0x51   : > { %500 = vmatmul.bf16.vlgmr.msra.gmra.mxu0 %v733_v24  ;;  %525 = vmatmul.bf16.vlgmr.msra.gmra.mxu3 %v773_v26 }
  0x52   : > { %569 = vmatmul.bf16.vlgmr.msra.gmra.mxu2 %v769_v25  ;;  %549 = vmatmul.bf16.vlgmr.msra.gmra.mxu1 %v737_v27 }
  0x61   : > { %505 = vmatmul.bf16.gmra.mxu0 %v741_v36  ;;  %530 = vmatmul.bf16.gmra.mxu3 %v781_v38 }
  0x62   : > { %574 = vmatmul.bf16.gmra.mxu2 %v777_v37  ;;  %554 = vmatmul.bf16.gmra.mxu1 %v745_v39 }
  0x71   : > { %510 = vmatmul.bf16.gmra.mxu0 %v749_v48  ;;  %535 = vmatmul.bf16.gmra.mxu3 %v789_v50 }
  0x72   : > { %579 = vmatmul.bf16.gmra.mxu2 %v785_v49  ;;  %559 = vmatmul.bf16.gmra.mxu1 %v753_v51 }
  0x81   : > { %515 = vmatmul.bf16.gmra.mxu0 %v757_v58 }
  0x82   : > { %584 = vmatmul.bf16.gmra.mxu2 %v793_v59  ;;  %564 = vmatmul.bf16.gmra.mxu1 %v761_v60 }
  0x91   : > { %520 = vmatmul.bf16.gmra.mxu0 %v765_v63 }
  0xce   : > { %v501_v1 = vpop.f32.mrf.mxu0 }
  0xcf   : > { %v502_v2 = vadd.f32 %v1286_v0, %v501_v1  ;;  %v550_v3 = vpop.f32.mrf.mxu1 }
  0xd1   : > { %v1289_v4 = vadd.f32 %v550_v3, %v502_v2 }
  0xd4   : > { %v526_v7 = vpop.f32.mrf.mxu3 }
  0xd5   : > { %v570_v5 = vpop.f32.mrf.mxu2  ;;  %v527_v46 = vadd.f32 %v1286_v0, %v526_v7 }
  0xd6   : > { %v503_v6 = vpop.f32.mrf.mxu0 }
  0xd7   : > { %v504_v8 = vadd.f32 %v1286_v0, %v503_v6  ;;  %v552_v9 = vpop.f32.mrf.mxu1 }
  0xd9   : > { %v1292_v10 = vadd.f32 %v552_v9, %v504_v8 }
  0xdc   : > { %v528_v13 = vpop.f32.mrf.mxu3 }
  0xdd   : > { %v572_v11 = vpop.f32.mrf.mxu2  ;;  %v529_v45 = vadd.f32 %v1286_v0, %v528_v13 }
  0xde   : > { %v1294_v12 = vpop.f32.mrf.mxu0 }
  0xdf   : > { %v1298_v21 = vpop.f32.mrf.mxu1  ;;  %v507_v13 = vadd.f32 %v1286_v0, %v1294_v12  ;;  %v608_v12 = vstv %s607_s6 }
  0xe4   : > { %v531_v16 = vpop.f32.mrf.mxu3 }
  0xe5   : > { %v575_v14 = vpop.f32.mrf.mxu2  ;;  %v532_v39 = vadd.f32 %v1286_v0, %v531_v16 }
  0xe6   : > { %v1296_v15 = vpop.f32.mrf.mxu0  ;;  %v576_v51 = vadd.f32 %v575_v14, %v527_v46 }
  0xe7   : > { %v557_v26 = vpop.f32.mrf.mxu1 }
  0xe8   : > { %v600_v54 = vmax.f32 %v576_v51, 0.0 }
  0xec   : > { %v533_v19 = vpop.f32.mrf.mxu3 }
  0xed   : > { %v577_v17 = vpop.f32.mrf.mxu2  ;;  %v534_v37 = vadd.f32 %v1286_v0, %v533_v19 }
  0xee   : > { %v511_v18 = vpop.f32.mrf.mxu0  ;;  %v578_v47 = vadd.f32 %v577_v17, %v529_v45  ;;  %v556_v17 = vadd.f32 %v1298_v21, %v507_v13 }
  0xef   : > { %v560_v30 = vpop.f32.mrf.mxu1  ;;  %v512_v6 = vadd.f32 %v1286_v0, %v511_v18 }
  0xf0   : > { %v601_v52 = vmax.f32 %v578_v47, 0.0  ;;  %v592_v19 = vmax.f32 %v556_v17, 0.0 }
  0xf1   : > { %v561_v9 = vadd.f32 %v560_v30, %v512_v6 }
  0xf3   : > { %v594_v16 = vmax.f32 %v561_v9, 0.0 }
  0xf4   : > { %v536_v24 = vpop.f32.mrf.mxu3 }
  0xf5   : > { %v580_v20 = vpop.f32.mrf.mxu2  ;;  %v537_v31 = vadd.f32 %v1286_v0, %v536_v24 }
  0xf6   : > { %v513_v22 = vpop.f32.mrf.mxu0  ;;  %v581_v43 = vadd.f32 %v580_v20, %v532_v39  ;;  %v591_v20 = vmax.f32 %v1292_v10, 0.0 }
  0xf7   : > { %v562_v42 = vpop.f32.mrf.mxu1  ;;  %v514_v1 = vadd.f32 %v1286_v0, %v513_v22 }
  0xf8   : > { %v602_v48 = vmax.f32 %v581_v43, 0.0 }
  0xf9   : > { %v563_v7 = vadd.f32 %v562_v42, %v514_v1 }
  0xfc   : > { %v538_v28 = vpop.f32.mrf.mxu3 }
  0xfd   : > { %v582_v23 = vpop.f32.mrf.mxu2  ;;  %v539_v32 = vadd.f32 %v1286_v0, %v538_v28 }
  0xfe   : > { %v516_v25 = vpop.f32.mrf.mxu0  ;;  %v583_v40 = vadd.f32 %v582_v23, %v534_v37 }
  0xff   : > { %v565_v50 = vpop.f32.mrf.mxu1  ;;  %v517_v61 = vadd.f32 %v1286_v0, %v516_v25 }
 0x100   : > { %v603_v44 = vmax.f32 %v583_v40, 0.0 }
 0x101   : > { %v566_v2 = vadd.f32 %v565_v50, %v517_v61 }
 0x103   : > { %v596_v8 = vmax.f32 %v566_v2, 0.0 }
 0x105   : > { %v585_v27 = vpop.f32.mrf.mxu2 }
 0x106   : > { %v518_v29 = vpop.f32.mrf.mxu0  ;;  %v586_v35 = vadd.f32 %v585_v27, %v537_v31 }
 0x107   : > { %v519_v57 = vadd.f32 %v1286_v0, %v518_v29  ;;  %v567_v60 = vpop.f32.mrf.mxu1 }
 0x108   : > { %v604_v41 = vmax.f32 %v586_v35, 0.0 }
 0x109   : > { %v568_v62 = vadd.f32 %v567_v60, %v519_v57 }
 0x10b   : > { %v597_v3 = vmax.f32 %v568_v62, 0.0 }
 0x10d   : > { %v587_v33 = vpop.f32.mrf.mxu2 }
 0x10e   : > { %v588_v34 = vadd.f32 %v587_v33, %v539_v32  ;;  %v521_v38 = vpop.f32.mrf.mxu0 }
 0x10f   : > { %v522_v55 = vadd.f32 %v1286_v0, %v521_v38 }
 0x110   : > { %v605_v36 = vmax.f32 %v588_v34, 0.0 }
 0x111   : > { %v571_v59 = vadd.f32 %v570_v5, %v522_v55  ;;  %v509_v5 = vadd.f32 %v1286_v0, %v1296_v15  ;;  %v590_v15 = vmax.f32 %v1289_v4, 0.0 }
 0x112   : > { %609 = vmatpush.xpose.msrb.mxu2 %v605_v36 }
 0x113   : > { %v598_v63 = vmax.f32 %v571_v59, 0.0  ;;  %v558_v14 = vadd.f32 %v557_v26, %v509_v5 }
 0x115   : > { %v593_v18 = vmax.f32 %v558_v14, 0.0 }
 0x116   : > { %610 = vmatpush.xpose.msrb.mxu2 %v604_v41  ;;  %v523_v49 = vpop.f32.mrf.mxu0 }
 0x117   : > { %v524_v53 = vadd.f32 %v1286_v0, %v523_v49  ;;  %v606_v0 = vld [vmem:[%s1359_s3] sm:$0x1] }
 0x119   : > { %v573_v56 = vadd.f32 %v572_v11, %v524_v53  ;;  %v595_v11 = vmax.f32 %v563_v7, 0.0 }
 0x11a   : > { %611 = vmatpush.xpose.msrb.mxu2 %v603_v44 }
 0x11b   : > { %v599_v58 = vmax.f32 %v573_v56, 0.0 }
 0x11e   : > { %612 = vmatpush.xpose.msrb.mxu2 %v602_v48 }
 0x122   : > { %613 = vmatpush.xpose.msrb.mxu2 %v601_v52 }
 0x126   : > { %614 = vmatpush.xpose.msrb.mxu2 %v600_v54 }
 0x12a   : > { %615 = vmatpush.xpose.msrb.mxu2 %v599_v58 }
 0x12e   : > { %616 = vmatpush.xpose.msrb.mxu2 %v598_v63 }
 0x132   : > { %617 = vmatpush.xpose.msrb.mxu2 %v597_v3 }
 0x136   : > { %618 = vmatpush.xpose.msrb.mxu2 %v596_v8 }
 0x13a   : > { %619 = vmatpush.xpose.msrb.mxu2 %v595_v11 }
 0x13e   : > { %620 = vmatpush.xpose.msrb.mxu2 %v594_v16 }
 0x142   : > { %621 = vmatpush.xpose.msrb.mxu2 %v593_v18 }
 0x146   : > { %622 = vmatpush.xpose.msrb.mxu2 %v592_v19 }
 0x14a   : > { %623 = vmatpush.xpose.msrb.mxu2 %v591_v20 }
 0x14e   : > { %624 = vmatpush.xpose.msrb.mxu2 %v590_v15 }
 0x151   : > { %625 = vmatmul.f32.vlgmr.msrb.gmra.mxu2 %v606_v0 }
 0x1d4   : > { %v626_v10 = vpop.f32.mrf.mxu2 }
 0x1d5   : > { %v627_v21 = vadd.f32 %v626_v10, %v608_v12 }
 0x1d7   : > { %629 = vst [vmem:[%s262_s16] sm:$0x1] %v627_v21 }
 0x1d8   : > { %1059 = shalt.err (!%p1056_p10)
}
 0x1d9   : > { %916 = dma.vmem_to_hbm [thread:$0]  (%p1209_p7), %s642_s17, 16, %s644_s18, %s631_s15  }
 0x1da PF: > { %s655_s24 = sand.u32 1, %s1090_s20   ;;  %p1367_p12 = scmp.ge.s32.totalorder %s1102_s23, 2 }
 0x1db   : > { %s656_s27 = scalar_lea.sflag [#allocation5], %s655_s24 }
 0x1dc   : > { %p927_p13 = pnand %p1367_p12, %p1177_p6 }
 0x1de   : > { %p928_p0 = pneg %p927_p13 }
 0x1e0   : > { %1085 = dma.done.wait (%p928_p0), %s656_s27, 16  }
 0x1e1   : > { %1087 = vsyncadd (%p928_p0), %s656_s27, 4294967280  ;;  %p20_p3 = scmp.ge.s32.totalorder %s1195_s8, 4   ;;  %s1368_s20 = smov %s1094_s21 }
 0x1e2   : > { %s1369_s21 = smov %s1098_s22  ;;  %s1370_s22 = smov %s1205_s13 }
 0x1e3   : > { %s1371_s23 = smov %s1195_s8  ;;  %22 = sbr.rel (!%p20_p3) target bundleno = 8 (0x8), region = 89 }
 0x1e8   :  { %661 = vsyncpa [#allocation4], 1 }
 0x1e9   :  { %663 = vsyncpa [#allocation4 + $0x1], 1 }
 0x1ea   :  { %664 = vsyncpa [#allocation7], 1 }
 0x1eb   :  { %665 = vsyncpa [#allocation5], 1 }
 0x1ec   :  { %667 = vsyncpa [#allocation5 + $0x1], 1 }

</bundles_post_ra>
